<compile_context>
chip_gen: v7x
topology: tpu7x:2x2x1
jax: 0.10.0
libtpu: 0.0.40
codegen_flags: <defaults>
</compile_context>

<pallas_src>
import functools

import jax
import jax.numpy as jnp
from jax.experimental import pallas as pl
from jax.experimental.pallas import tpu as pltpu


def _vmem_capacity_bytes():
    try:
        return int(getattr(pltpu.get_tpu_info(), "vmem_capacity_bytes", 128 << 20))
    except Exception:
        return 64 << 20  # assume the smallest (v7x per-TC) if the query fails


def _choose_token_tile(total, N, H, dtype):
    """Largest token tile (a divisor of `total`) whose honest per-step VMEM
    footprint (double-buffered blocks + weight blocks + f32 temporaries) fits
    a generation-aware budget.  Returns (tile, estimated_footprint_bytes)."""
    itemsize = jnp.dtype(dtype).itemsize
    min_ts = {4: 8, 2: 16, 1: 32}.get(itemsize, 8)       # dtype-gated sublane minimum

    cap = _vmem_capacity_bytes()
    budget = max(8 << 20, min(cap // 3, 40 << 20))       # ~21 MiB on v7x, ~40 MiB on v5e/v6e

    weights_bytes = (2 * 3 * H * H + 2 * H) * itemsize   # 3 HxH + bias, double-buffered
    per_token = (3 * H + 2 * N * H) * itemsize * 2       # q/res/out + k/v blocks, 2 buffers
    per_token += (4 * H + 4 * N) * 4                     # f32 ql/q2/weighted/ctx + cols/exps
    max_ts = max(min_ts, (budget - weights_bytes) // max(per_token, 1))

    cand = [t for t in (4096, 2048, 1024, 512, 256, 128, 64, 32, 16, 8)
            if t >= min_ts and total % t == 0]
    if not cand:
        ts = total                                        # single tile; block == full dims
    else:
        fitting = [t for t in cand if t <= max_ts]
        if not fitting:
            ts = cand[-1]                                 # smallest legal divisor
        else:
            multi = [t for t in fitting if total // t >= 2]  # prefer >=2 grid steps (v7x)
            ts = multi[0] if multi else fitting[0]
    return ts, weights_bytes + ts * per_token


def _bert_fusion_kernel(q_ref, k_ref, v_ref, res_ref,
                        wq_t_ref, bq_ref, wk_ref, wv_t_ref, o_ref,
                        *, inv_temperature):
    in_dt = q_ref.dtype
    ts, h = q_ref.shape
    n_adapters = k_ref.shape[1] // h

    # Query projection (MXU, f32 accumulate):  ql = q @ Wq^T + bq
    ql = jnp.dot(q_ref[...], wq_t_ref[...], preferred_element_type=jnp.float32)
    ql = ql + bq_ref[...].astype(jnp.float32)                        # [TS, H] f32

    # Key projection folded into the query side.  The bk term is dropped:
    # it is constant over the adapter axis, and softmax over that axis
    # (including the /T scaling) is invariant to a per-token constant.
    q2 = jnp.dot(ql.astype(in_dt), wk_ref[...],
                 preferred_element_type=jnp.float32).astype(in_dt)   # [TS, H]

    # Per-adapter scores: multiply in the input dtype, accumulate in f32.
    cols = []
    for n in range(n_adapters):
        kn = k_ref[:, n * h:(n + 1) * h]                             # [TS, H]
        cols.append(jnp.sum(q2 * kn, axis=-1, dtype=jnp.float32,
                            keepdims=True))                          # [TS, 1]
    if inv_temperature != 1.0:                                       # trace-time constant
        cols = [c * inv_temperature for c in cols]

    # TODO(synk): dropout on the attention scores (training mode) not implemented.

    # Column-wise softmax over the adapter axis: no [TS, N] materialization,
    # no cross-lane reduce; exact divide (reduce over N is tiny).
    m = cols[0]
    for c in cols[1:]:
        m = jnp.maximum(m, c)
    exps = [jnp.exp(c - m) for c in cols]
    denom = exps[0]
    for e in exps[1:]:
        denom = denom + e
    inv = 1.0 / denom                                                # [TS, 1] f32

    # Adapter-weighted value sum; Wv folded to after the reduction (no bias).
    weighted = jnp.zeros((ts, h), jnp.float32)
    for n in range(n_adapters):
        p_n = (exps[n] * inv).astype(in_dt)                          # [TS, 1]
        vn = v_ref[:, n * h:(n + 1) * h]                             # [TS, H]
        weighted = weighted + (p_n * vn).astype(jnp.float32)

    ctx = jnp.dot(weighted.astype(in_dt), wv_t_ref[...],
                  preferred_element_type=jnp.float32)                # [TS, H]

    # residual_before == False -> add residual after attention.
    o_ref[...] = (ctx + res_ref[...].astype(jnp.float32)).astype(o_ref.dtype)


def bert_fusion(query, key, value, residual, params, *, temperature=1.0):
    """query/residual: [B, S, H]; key/value: [B, S, N, H] (N = fused adapters)."""
    B, S, H = query.shape
    N = key.shape[2]
    in_dt = query.dtype
    T = B * S                                   # batch folded into the token axis

    q2d = query.reshape(T, H)                   # all reshapes are free / contiguous
    r2d = residual.reshape(T, H)
    k2d = key.reshape(T, N * H)
    v2d = value.reshape(T, N * H)

    wq_t = params["wq"].T.astype(in_dt)         # y = x @ Wq^T + bq
    bq = params["bq"].reshape(1, H).astype(in_dt)
    wk = params["wk"].astype(in_dt)             # fold: q2 = ql @ Wk   (bk dropped exactly)
    wv_t = params["wv"].T.astype(in_dt)         # fold: ctx = weighted @ Wv^T

    TS, footprint = _choose_token_tile(T, N, H, in_dt)
    cap = _vmem_capacity_bytes()
    vmem_limit = int(min(cap * 3 // 4, max(32 << 20, footprint + (8 << 20))))

    kernel = functools.partial(
        _bert_fusion_kernel, inv_temperature=float(1.0 / float(temperature)))

    out2d = pl.pallas_call(
        kernel,
        out_shape=jax.ShapeDtypeStruct((T, H), query.dtype),
        grid=(T // TS,),
        in_specs=[
            pl.BlockSpec((TS, H), lambda i: (i, 0)),         # query     [T, H]
            pl.BlockSpec((TS, N * H), lambda i: (i, 0)),     # key       [T, N*H]
            pl.BlockSpec((TS, N * H), lambda i: (i, 0)),     # value     [T, N*H]
            pl.BlockSpec((TS, H), lambda i: (i, 0)),         # residual  [T, H]
            pl.BlockSpec((H, H), lambda i: (0, 0)),          # Wq^T
            pl.BlockSpec((1, H), lambda i: (0, 0)),          # bq
            pl.BlockSpec((H, H), lambda i: (0, 0)),          # Wk
            pl.BlockSpec((H, H), lambda i: (0, 0)),          # Wv^T
        ],
        out_specs=pl.BlockSpec((TS, H), lambda i: (i, 0)),
        compiler_params=pltpu.CompilerParams(
            dimension_semantics=("parallel",),
            vmem_limit_bytes=vmem_limit),
    )(q2d, k2d, v2d, r2d, wq_t, bq, wk, wv_t)

    return out2d.reshape(B, S, H)


def bert_fusion_ref(query, key, value, residual, params, *, temperature=1.0):
    """Pure-JAX reference mirroring the PyTorch forward (eval mode), including bk."""
    ql = query @ params["wq"].T + params["bq"]
    kl = key @ params["wk"].T + params["bk"]
    vl = value @ params["wv"].T
    scores = jnp.einsum("bsh,bsnh->bsn", ql, kl)
    probs = jax.nn.softmax(scores / temperature, axis=-1)
    ctx = jnp.einsum("bsn,bsnh->bsh", probs, vl)
    return ctx + residual


if __name__ == "__main__":
    B, S, N, H = 2, 8, 4, 32
    root = jax.random.PRNGKey(0)
    ks = jax.random.split(root, 10)

    query = jax.random.normal(ks[0], (B, S, H), jnp.float32)
    key_in = jax.random.normal(ks[1], (B, S, N, H), jnp.float32)
    value_in = jax.random.normal(ks[2], (B, S, N, H), jnp.float32)
    residual = jax.random.normal(ks[3], (B, S, H), jnp.float32)

    # (1) Module-faithful init: init_bert_weights (std 0.02, zero bias);
    #     value_initialized -> identity + 1e-6 off-diagonal, no bias.
    params_init = {
        "wq": 0.02 * jax.random.normal(ks[4], (H, H), jnp.float32),
        "bq": jnp.zeros((H,), jnp.float32),
        "wk": 0.02 * jax.random.normal(ks[5], (H, H), jnp.float32),
        "bk": jnp.zeros((H,), jnp.float32),
        "wv": jnp.full((H, H), 1e-6, jnp.float32).at[jnp.arange(H), jnp.arange(H)].set(1.0),
    }
    # (2) Stress params: nonzero biases + random Wv (exercises the Wk/Wv folds
    #     and the exactness of dropping the bk term from the kernel).
    params_rand = {
        "wq": 0.02 * jax.random.normal(ks[4], (H, H), jnp.float32),
        "bq": 0.1 * jax.random.normal(ks[6], (H,), jnp.float32),
        "wk": 0.02 * jax.random.normal(ks[5], (H, H), jnp.float32),
        "bk": 0.1 * jax.random.normal(ks[7], (H,), jnp.float32),
        "wv": 0.05 * jax.random.normal(ks[8], (H, H), jnp.float32),
    }

    ok = True
    for params in (params_init, params_rand):
        out = jax.block_until_ready(
            bert_fusion(query, key_in, value_in, residual, params, temperature=1.0))
        ref = bert_fusion_ref(query, key_in, value_in, residual, params, temperature=1.0)
        assert out.shape == (B, S, H)
        ok = ok and bool(jnp.allclose(out, ref, atol=1e-3, rtol=1e-3))
    assert ok, "mismatch vs pure-JAX reference"

    print("KERNEL_OK")
</pallas_src>

<mosaic_0001>
module attributes {stable_mosaic.version = 11 : i64} {
  func.func @_bert_fusion_kernel(%arg0: i32, %arg1: memref<8x32xf32, #tpu.memory_space<vmem>>, %arg2: memref<8x128xf32, #tpu.memory_space<vmem>>, %arg3: memref<8x128xf32, #tpu.memory_space<vmem>>, %arg4: memref<8x32xf32, #tpu.memory_space<vmem>>, %arg5: memref<32x32xf32, #tpu.memory_space<vmem>>, %arg6: memref<1x32xf32, #tpu.memory_space<vmem>>, %arg7: memref<32x32xf32, #tpu.memory_space<vmem>>, %arg8: memref<32x32xf32, #tpu.memory_space<vmem>>, %arg9: memref<8x32xf32, #tpu.memory_space<vmem>>) attributes {dimension_semantics = [#tpu.dimension_semantics<parallel>], iteration_bounds = array<i64: 2>, scalar_prefetch = 0 : i64, scratch_operands = 0 : i64, tpu.core_type = #tpu.core_type<tc>, window_params = [{transform_indices = @transform_0, window_bounds = array<i64: 8, 32>}, {transform_indices = @transform_1, window_bounds = array<i64: 8, 128>}, {transform_indices = @transform_2, window_bounds = array<i64: 8, 128>}, {transform_indices = @transform_3, window_bounds = array<i64: 8, 32>}, {pipeline_mode = #tpu.pipeline_mode<synchronous>, transform_indices = @transform_4, window_bounds = array<i64: 32, 32>}, {pipeline_mode = #tpu.pipeline_mode<synchronous>, transform_indices = @transform_5, window_bounds = array<i64: 1, 32>}, {pipeline_mode = #tpu.pipeline_mode<synchronous>, transform_indices = @transform_6, window_bounds = array<i64: 32, 32>}, {pipeline_mode = #tpu.pipeline_mode<synchronous>, transform_indices = @transform_7, window_bounds = array<i64: 32, 32>}, {transform_indices = @transform_8, window_bounds = array<i64: 8, 32>}]} {
    %c0 = arith.constant 0 : index
    %c0_0 = arith.constant 0 : index
    %0 = vector.load %arg1[%c0, %c0_0] : memref<8x32xf32, #tpu.memory_space<vmem>>, vector<8x32xf32>
    %c0_1 = arith.constant 0 : index
    %c0_2 = arith.constant 0 : index
    %1 = vector.load %arg5[%c0_1, %c0_2] : memref<32x32xf32, #tpu.memory_space<vmem>>, vector<32x32xf32>
    %cst = arith.constant dense<0.000000e+00> : vector<8x32xf32>
    %2 = tpu.matmul %0, %1, %cst {dimension_numbers = #tpu.dot_dimension_numbers<[1], [0], [0], [1], [0, 0, 1, 1], [], []>} : vector<8x32xf32>, vector<32x32xf32>, vector<8x32xf32> -> vector<8x32xf32>
    %c0_3 = arith.constant 0 : index
    %c0_4 = arith.constant 0 : index
    %3 = vector.load %arg6[%c0_3, %c0_4] : memref<1x32xf32, #tpu.memory_space<vmem>>, vector<1x32xf32>
    %4 = vector.broadcast %3 : vector<1x32xf32> to vector<8x32xf32>
    %5 = arith.addf %2, %4 : vector<8x32xf32>
    %c0_5 = arith.constant 0 : index
    %c0_6 = arith.constant 0 : index
    %6 = vector.load %arg7[%c0_5, %c0_6] : memref<32x32xf32, #tpu.memory_space<vmem>>, vector<32x32xf32>
    %cst_7 = arith.constant dense<0.000000e+00> : vector<8x32xf32>
    %7 = tpu.matmul %5, %6, %cst_7 {dimension_numbers = #tpu.dot_dimension_numbers<[1], [0], [0], [1], [0, 0, 1, 1], [], []>} : vector<8x32xf32>, vector<32x32xf32>, vector<8x32xf32> -> vector<8x32xf32>
    %c0_8 = arith.constant 0 : index
    %c0_9 = arith.constant 0 : index
    %8 = vector.load %arg2[%c0_8, %c0_9] : memref<8x128xf32, #tpu.memory_space<vmem>>, vector<8x32xf32>
    %9 = arith.mulf %7, %8 : vector<8x32xf32>
    %cst_10 = arith.constant dense<0.000000e+00> : vector<8xf32>
    %10 = vector.multi_reduction <add>, %9, %cst_10 [1] : vector<8x32xf32> to vector<8xf32>
    %11 = vector.shape_cast %10 : vector<8xf32> to vector<8x1xf32>
    %c0_11 = arith.constant 0 : index
    %c32 = arith.constant 32 : index
    %12 = vector.load %arg2[%c0_11, %c32] : memref<8x128xf32, #tpu.memory_space<vmem>>, vector<8x32xf32>
    %13 = arith.mulf %7, %12 : vector<8x32xf32>
    %cst_12 = arith.constant dense<0.000000e+00> : vector<8xf32>
    %14 = vector.multi_reduction <add>, %13, %cst_12 [1] : vector<8x32xf32> to vector<8xf32>
    %15 = vector.shape_cast %14 : vector<8xf32> to vector<8x1xf32>
    %c0_13 = arith.constant 0 : index
    %c64 = arith.constant 64 : index
    %16 = vector.load %arg2[%c0_13, %c64] : memref<8x128xf32, #tpu.memory_space<vmem>>, vector<8x32xf32>
    %17 = arith.mulf %7, %16 : vector<8x32xf32>
    %cst_14 = arith.constant dense<0.000000e+00> : vector<8xf32>
    %18 = vector.multi_reduction <add>, %17, %cst_14 [1] : vector<8x32xf32> to vector<8xf32>
    %19 = vector.shape_cast %18 : vector<8xf32> to vector<8x1xf32>
    %c0_15 = arith.constant 0 : index
    %c96 = arith.constant 96 : index
    %20 = vector.load %arg2[%c0_15, %c96] : memref<8x128xf32, #tpu.memory_space<vmem>>, vector<8x32xf32>
    %21 = arith.mulf %7, %20 : vector<8x32xf32>
    %cst_16 = arith.constant dense<0.000000e+00> : vector<8xf32>
    %22 = vector.multi_reduction <add>, %21, %cst_16 [1] : vector<8x32xf32> to vector<8xf32>
    %23 = vector.shape_cast %22 : vector<8xf32> to vector<8x1xf32>
    %24 = arith.maximumf %11, %15 : vector<8x1xf32>
    %25 = arith.maximumf %24, %19 : vector<8x1xf32>
    %26 = arith.maximumf %25, %23 : vector<8x1xf32>
    %27 = arith.subf %11, %26 : vector<8x1xf32>
    %28 = math.exp %27 : vector<8x1xf32>
    %29 = arith.subf %15, %26 : vector<8x1xf32>
    %30 = math.exp %29 : vector<8x1xf32>
    %31 = arith.subf %19, %26 : vector<8x1xf32>
    %32 = math.exp %31 : vector<8x1xf32>
    %33 = arith.subf %23, %26 : vector<8x1xf32>
    %34 = math.exp %33 : vector<8x1xf32>
    %35 = arith.addf %28, %30 : vector<8x1xf32>
    %36 = arith.addf %35, %32 : vector<8x1xf32>
    %37 = arith.addf %36, %34 : vector<8x1xf32>
    %cst_17 = arith.constant 1.000000e+00 : f32
    %38 = vector.broadcast %cst_17 : f32 to vector<8x1xf32>
    %39 = arith.divf %38, %37 : vector<8x1xf32>
    %cst_18 = arith.constant 0.000000e+00 : f32
    %40 = vector.broadcast %cst_18 : f32 to vector<8x32xf32>
    %41 = arith.mulf %28, %39 : vector<8x1xf32>
    %c0_19 = arith.constant 0 : index
    %c0_20 = arith.constant 0 : index
    %42 = vector.load %arg3[%c0_19, %c0_20] : memref<8x128xf32, #tpu.memory_space<vmem>>, vector<8x32xf32>
    %43 = vector.broadcast %41 : vector<8x1xf32> to vector<8x32xf32>
    %44 = arith.mulf %43, %42 : vector<8x32xf32>
    %45 = arith.addf %40, %44 : vector<8x32xf32>
    %46 = arith.mulf %30, %39 : vector<8x1xf32>
    %c0_21 = arith.constant 0 : index
    %c32_22 = arith.constant 32 : index
    %47 = vector.load %arg3[%c0_21, %c32_22] : memref<8x128xf32, #tpu.memory_space<vmem>>, vector<8x32xf32>
    %48 = vector.broadcast %46 : vector<8x1xf32> to vector<8x32xf32>
    %49 = arith.mulf %48, %47 : vector<8x32xf32>
    %50 = arith.addf %45, %49 : vector<8x32xf32>
    %51 = arith.mulf %32, %39 : vector<8x1xf32>
    %c0_23 = arith.constant 0 : index
    %c64_24 = arith.constant 64 : index
    %52 = vector.load %arg3[%c0_23, %c64_24] : memref<8x128xf32, #tpu.memory_space<vmem>>, vector<8x32xf32>
    %53 = vector.broadcast %51 : vector<8x1xf32> to vector<8x32xf32>
    %54 = arith.mulf %53, %52 : vector<8x32xf32>
    %55 = arith.addf %50, %54 : vector<8x32xf32>
    %56 = arith.mulf %34, %39 : vector<8x1xf32>
    %c0_25 = arith.constant 0 : index
    %c96_26 = arith.constant 96 : index
    %57 = vector.load %arg3[%c0_25, %c96_26] : memref<8x128xf32, #tpu.memory_space<vmem>>, vector<8x32xf32>
    %58 = vector.broadcast %56 : vector<8x1xf32> to vector<8x32xf32>
    %59 = arith.mulf %58, %57 : vector<8x32xf32>
    %60 = arith.addf %55, %59 : vector<8x32xf32>
    %c0_27 = arith.constant 0 : index
    %c0_28 = arith.constant 0 : index
    %61 = vector.load %arg8[%c0_27, %c0_28] : memref<32x32xf32, #tpu.memory_space<vmem>>, vector<32x32xf32>
    %cst_29 = arith.constant dense<0.000000e+00> : vector<8x32xf32>
    %62 = tpu.matmul %60, %61, %cst_29 {dimension_numbers = #tpu.dot_dimension_numbers<[1], [0], [0], [1], [0, 0, 1, 1], [], []>} : vector<8x32xf32>, vector<32x32xf32>, vector<8x32xf32> -> vector<8x32xf32>
    %c0_30 = arith.constant 0 : index
    %c0_31 = arith.constant 0 : index
    %63 = vector.load %arg4[%c0_30, %c0_31] : memref<8x32xf32, #tpu.memory_space<vmem>>, vector<8x32xf32>
    %64 = arith.addf %62, %63 : vector<8x32xf32>
    %c0_32 = arith.constant 0 : index
    %c0_33 = arith.constant 0 : index
    %65 = vector.load %arg9[%c0_32, %c0_33] : memref<8x32xf32, #tpu.memory_space<vmem>>, vector<8x32xf32>
    tpu.vector_store %arg9[%c0_32, %c0_33], %64 {strides = array<i32>} : memref<8x32xf32, #tpu.memory_space<vmem>>, vector<8x32xf32>,
    return
  }
  func.func @transform_0(%arg0: i32) -> (i32, i32) {
    %c0_i32 = arith.constant 0 : i32
    %c0_i32_0 = arith.constant 0 : i32
    return %arg0, %c0_i32 : i32, i32
  }
  func.func @transform_1(%arg0: i32) -> (i32, i32) {
    %c0_i32 = arith.constant 0 : i32
    %c0_i32_0 = arith.constant 0 : i32
    return %arg0, %c0_i32 : i32, i32
  }
  func.func @transform_2(%arg0: i32) -> (i32, i32) {
    %c0_i32 = arith.constant 0 : i32
    %c0_i32_0 = arith.constant 0 : i32
    return %arg0, %c0_i32 : i32, i32
  }
  func.func @transform_3(%arg0: i32) -> (i32, i32) {
    %c0_i32 = arith.constant 0 : i32
    %c0_i32_0 = arith.constant 0 : i32
    return %arg0, %c0_i32 : i32, i32
  }
  func.func @transform_4(%arg0: i32) -> (i32, i32) {
    %c0_i32 = arith.constant 0 : i32
    %c0_i32_0 = arith.constant 0 : i32
    %c0_i32_1 = arith.constant 0 : i32
    return %c0_i32, %c0_i32_0 : i32, i32
  }
  func.func @transform_5(%arg0: i32) -> (i32, i32) {
    %c0_i32 = arith.constant 0 : i32
    %c0_i32_0 = arith.constant 0 : i32
    %c0_i32_1 = arith.constant 0 : i32
    return %c0_i32, %c0_i32_0 : i32, i32
  }
  func.func @transform_6(%arg0: i32) -> (i32, i32) {
    %c0_i32 = arith.constant 0 : i32
    %c0_i32_0 = arith.constant 0 : i32
    %c0_i32_1 = arith.constant 0 : i32
    return %c0_i32, %c0_i32_0 : i32, i32
  }
  func.func @transform_7(%arg0: i32) -> (i32, i32) {
    %c0_i32 = arith.constant 0 : i32
    %c0_i32_0 = arith.constant 0 : i32
    %c0_i32_1 = arith.constant 0 : i32
    return %c0_i32, %c0_i32_0 : i32, i32
  }
  func.func @transform_8(%arg0: i32) -> (i32, i32) {
    %c0_i32 = arith.constant 0 : i32
    %c0_i32_0 = arith.constant 0 : i32
    return %arg0, %c0_i32 : i32, i32
  }
}

</mosaic_0001>

<bundles_post_ra>
// kernel: tpu_custom_call.1
= control target key start
LH: loop header
LB: loop body
LE: loop exit
PB: predicated region body
PF: predicated region fallthrough
CT: control target
= control target key end

     0   :  { %s1917_s0 = inlined_call_operand.hbm [shape: f32[16,32], index: 0, kind: input, shape index: {}]   ;;  %s1918_s1 = inlined_call_operand.hbm [shape: f32[16,128], index: 1, kind: input, shape index: {}]   ;;  %s1919_s2 = inlined_call_operand.hbm [shape: f32[16,128], index: 2, kind: input, shape index: {}]   ;;  %s1920_s3 = inlined_call_operand.hbm [shape: f32[16,32], index: 3, kind: input, shape index: {}]   ;;  %s1921_s4 = inlined_call_operand.hbm [shape: f32[32,32], index: 4, kind: input, shape index: {}]   ;;  %s1922_s5 = inlined_call_operand.vmem [shape: f32[1,32], index: 5, kind: input, shape index: {}]   ;;  %s1923_s6 = inlined_call_operand.hbm [shape: f32[32,32], index: 6, kind: input, shape index: {}]   ;;  %s1924_s7 = inlined_call_operand.hbm [shape: f32[32,32], index: 7, kind: input, shape index: {}]   ;;  %s1925_s8 = inlined_call_operand.hbm [shape: f32[16,32], index: 8, kind: output, shape index: {}]  }
   0x1   :  { %1943 = sst [smem:[#allocation25_spill]] %s1918_s1 }
   0x2   :  { %1944 = sst [smem:[#allocation26_spill]] %s1921_s4 }
   0x3   :  { %1945 = sst [smem:[#allocation27_spill]] %s1923_s6 }
   0x4   :  { %13 = vsyncpa [#allocation3], 0 }
   0x5   :  { %15 = vsyncpa [#allocation3 + $0x1], 0 }
   0x6   :  { %16 = vsyncpa [#allocation6], 0 }
   0x7   :  { %18 = vsyncpa [#allocation6 + $0x1], 0 }
   0x8   :  { %19 = vsyncpa [#allocation9], 0 }
   0x9   :  { %21 = vsyncpa [#allocation9 + $0x1], 0 }
   0xa   :  { %22 = vsyncpa [#allocation12], 0 }
   0xb   :  { %23 = vsyncpa [#allocation4], 0 }
   0xc   :  { %25 = vsyncpa [#allocation4 + $0x1], 0  ;;  %s1520_s27 = smov 0   ;;  %s1522_s28 = smov 0  }
   0xd   :  { %s1524_s29 = smov 0   ;;  %s1526_s30 = smov 0  }
   0xe LB: > { %1946 = sst [smem:[#allocation21_spill]] %s1445_s27  ;;  %s1541_s9 = sadd.s32 4294967295, %s1457_s30   ;;  %s1457_s30 = sphi %s1526_s30, %s1982_s30   ;;  %s1453_s29 = sphi %s1524_s29, %s1986_s29   ;;  %s1449_s28 = sphi %s1522_s28, %s1985_s28   ;;  %s1445_s27 = sphi %s1520_s27, %s1984_s27  }
   0xf   : > { %s964_s10 = sadd.s32 4294967294, %s1457_s30   ;;  %p51_p0 = scmp.ne.s32.totalorder %s1449_s28, %s1445_s27 }
  0x10   : > { %p1926_p1 = scmp.eq.s32.totalorder %s1541_s9, 0  ;;  %p243_p3 = scmp.eq.s32.totalorder %s964_s10, 1 }
  0x11   : > { %p965_p5 = scmp.ge.s32.totalorder %s1457_s30, 1  ;;  %p250_p7 = scmp.lt.s32.totalorder %s1457_s30, 3 }
  0x12   : > { %p1550_p4 = por %p1926_p1, %p51_p0  ;;  %p1555_p6 = por %p243_p3, %p51_p0 }
  0x13   : > { %p1560_p8 = pnand %p965_p5, %p250_p7  ;;  %s1459_s14 = smov [#allocation10]  }
  0x14   : > { %s1947_s11 = scalar_select %p1550_p4, 1, 0 }
  0x15   : > { %s1948_s12 = scalar_select %p1555_p6, 1, 0 }
  0x16   : > { %s1950_s13 = scalar_select %p1560_p8, 1, 0 }
  0x17   : > { %1949 = sst [smem:[#allocation22_spill]] %s1948_s12  ;;  %s262_s15 = sshll.u32 %s1459_s14, 4  ;;  %s1564_s15 = int_to_ptr.vmem [resolvable:$true] %s262_s15 }
  0x18   : > { %p1083_p9 = pneg %p1560_p8  ;;  %s1460_s17 = smov [#allocation11]  }
  0x19   : > { %s278_s18 = sshll.u32 %s1460_s17, 4  ;;  %s1952_s4 = sld [smem:[#allocation26_spill]]  ;;  %s1575_s18 = int_to_ptr.vmem [resolvable:$true] %s278_s18 }
  0x1a   : > { %p1571_p11 = pnand %p1083_p9, %p1926_p1 }
  0x1c   : > { %s1951_s16 = scalar_select %p1571_p11, 1, 0 }
  0x1d   : > { %p1585_p13 = pneg %p1571_p11 }
  0x1f   : > { %s1171_s21 = scalar_lea.hbm %s1952_s4, 512 }
  0x20   : > { %p1172_p12 = scmp.ne.s32.totalorder %s1952_s4, %s1171_s21  ;;  %p1178_p5 = scmp.lt.u32.totalorder %s1171_s21, %s1952_s4 }
  0x21   : > { %s1953_s24 = scalar_select %p1585_p13, 1, 0 }
  0x22   : > { %p1174_p0 = pnand %p1585_p13, %p1172_p12 }
  0x24   : > { %p1175_p3 = pneg %p1174_p0 }
  0x26   : > { %p1180_p7 = pnand %p1178_p5, %p1175_p3 }
  0x28   : > { %1183 = shalt.err (!%p1180_p7)
}
  0x29   : > { %s1184_s10 = scalar_lea.vmem %s1564_s15, 512  ;;  %p1192_p2 = scmp.lt.s32.totalorder %s1564_s15, %s1564_s15 }
  0x2a   : > { %p1185_p9 = scmp.ne.s32.totalorder %s1564_s15, %s1184_s10  ;;  %p1193_p6 = scmp.lt.s32.totalorder %s1184_s10, %s1184_s10 }
  0x2c   : > { %p1187_p10 = pnand %p1185_p9, %p1585_p13  ;;  %p1194_p12 = por %p1193_p6, %p1192_p2 }
  0x2e   : > { %p1188_p1 = pneg %p1187_p10 }
  0x30   : > { %p1195_p0 = pnand %p1194_p12, %p1188_p1 }
  0x32   : > { %1198 = shalt.err (!%p1195_p0)
}
  0x33   : > { %s1929_s14 = smov 128   ;;  %s1930_s17 = smov 8  }
  0x34   : > { %1086 = dma.hbm_to_vmem [thread:$0]  (!%p1571_p11), %s1952_s4, 512, %s1564_s15, [#allocation9], %s1929_s14, %s1929_s14, %s1930_s17  }
  0x35   : > { %s1954_s6 = sld [smem:[#allocation27_spill]] }
  0x3b   : > { %s1199_s23 = scalar_lea.hbm %s1954_s6, 512 }
  0x3c   : > { %p1200_p1 = scmp.ne.s32.totalorder %s1954_s6, %s1199_s23  ;;  %p1206_p10 = scmp.lt.u32.totalorder %s1199_s23, %s1954_s6 }
  0x3e   : > { %p1202_p2 = pnand %p1200_p1, %p1585_p13 }
  0x40   : > { %p1203_p6 = pneg %p1202_p2 }
  0x42   : > { %p1208_p3 = pnand %p1206_p10, %p1203_p6 }
  0x44   : > { %1211 = shalt.err (!%p1208_p3)
}
  0x45   : > { %s1212_s15 = scalar_lea.vmem %s1575_s18, 512  ;;  %p1220_p12 = scmp.lt.s32.totalorder %s1575_s18, %s1575_s18 }
  0x46   : > { %p1213_p5 = scmp.ne.s32.totalorder %s1575_s18, %s1212_s15  ;;  %p1221_p0 = scmp.lt.s32.totalorder %s1212_s15, %s1212_s15 }
  0x48   : > { %p1215_p7 = pnand %p1213_p5, %p1585_p13  ;;  %p1222_p1 = por %p1221_p0, %p1220_p12 }
  0x4a   : > { %p1216_p9 = pneg %p1215_p7 }
  0x4c   : > { %p1223_p2 = pnand %p1222_p1, %p1216_p9 }
  0x4e   : > { %1226 = shalt.err (!%p1223_p2)
}
  0x4f   : > { %1089 = dma.hbm_to_vmem [thread:$0]  (!%p1571_p11), %s1954_s6, 512, %s1575_s18, [#allocation12], %s1929_s14, %s1929_s14, %s1930_s17  }
  0x50   : > { %s1636_s20 = sadd.s32 1, %s1457_s30   ;;  %s38_s21 = sadd.s32 1, %s1453_s29 }
  0x51   : > { %1955 = sst [smem:[#allocation23_spill]] %s1636_s20  ;;  %s35_s22 = ssub.s32 %s1457_s30, %s1636_s20 }
  0x52   : > { %p45_p6 = scmp.ne.s32.totalorder %s1453_s29, %s1449_s28  ;;  %p36_p10 = scmp.eq.s32.totalorder %s35_s22, 0 }
  0x53   : > { %p46_p3 = scmp.eq.s32.totalorder %s1457_s30, 0  ;;  %p1956_p5 = scmp.eq.s32.totalorder %s1541_s9, 1 }
  0x54   : > { %p1113_p9 = scmp.lt.s32.totalorder %s1457_s30, 2  ;;  %s1928_s26 = sand.u32 1, %s1453_s29  }
  0x55   : > { %p1646_p7 = por %p1956_p5, %p45_p6  ;;  %p47_p12 = por %p46_p3, %p45_p6 }
  0x56   : > { %s1652_s25 = scalar_select %p36_p10, %s1453_s29, %s38_s21  }
  0x57   : > { %s1957_s23 = scalar_select %p1646_p7, 1, 0 }
  0x58   : > { %1958 = sst [smem:[#allocation24_spill]] %s1652_s25  ;;  %s1657_s18 = sshll.u32 %s1928_s26, 3 }
  0x59   : > { %s1660_s10 = sshll.u32 %s1457_s30, 7  ;;  %p1662_p0 = pnand %p1113_p9, %p47_p12 }
  0x5a   : > { %s1935_s12 = sand.u32 1, %s1457_s30   ;;  %s1960_s1 = sld [smem:[#allocation25_spill]] }
  0x5b   : > { %s1959_s15 = scalar_select %p1662_p0, 1, 0 }
  0x5c   : > { %s327_s26 = scalar_lea.vmem [#allocation5], %s1657_s18  ;;  %s1678_s17 = scalar_lea.sflag [#allocation6], %s1935_s12 }
  0x5d   : > { %s334_s14 = sshll.u32 %s327_s26, 4  ;;  %p1684_p2 = pneg %p1662_p0  ;;  %s1674_s14 = int_to_ptr.vmem [resolvable:$true] %s334_s14 }
  0x60   : > { %s1671_s21 = scalar_lea.hbm %s1960_s1, %s1660_s10  ;;  %s1232_s26 = scalar_lea.hbm %s1960_s1, 256 }
  0x61   : > { %s1227_s4 = scalar_lea.hbm %s1671_s21, 128  ;;  %p1233_p3 = scmp.lt.u32.totalorder %s1671_s21, %s1960_s1 }
  0x62   : > { %p1228_p1 = scmp.ne.s32.totalorder %s1671_s21, %s1227_s4  ;;  %p1234_p5 = scmp.lt.u32.totalorder %s1232_s26, %s1227_s4 }
  0x63   : > { %p1236_p12 = scmp.lt.u32.totalorder %s1227_s4, %s1671_s21 }
  0x64   : > { %p1230_p6 = pnand %p1684_p2, %p1228_p1  ;;  %p1235_p9 = por %p1234_p5, %p1233_p3 }
  0x66   : > { %p1231_p10 = pneg %p1230_p6  ;;  %p1237_p7 = por %p1236_p12, %p1235_p9 }
  0x68   : > { %p1238_p4 = pnand %p1237_p7, %p1231_p10 }
  0x6a   : > { %1241 = shalt.err (!%p1238_p4)
}
  0x6b   : > { %s1242_s12 = scalar_lea.vmem %s1674_s14, 128  ;;  %s1463_s19 = smov [#allocation5]  }
  0x6c   : > { %p1243_p1 = scmp.ne.s32.totalorder %s1674_s14, %s1242_s12  ;;  %s1247_s22 = sshll.u32 %s1463_s19, 4  ;;  %s1248_s22 = int_to_ptr.vmem [resolvable:$false] %s1247_s22 }
  0x6d   : > { %s1249_s20 = scalar_lea.vmem %s1248_s22, 256  ;;  %p1250_p11 = scmp.lt.s32.totalorder %s1674_s14, %s1248_s22 }
  0x6e   : > { %p1245_p6 = pnand %p1243_p1, %p1684_p2  ;;  %p1251_p13 = scmp.lt.s32.totalorder %s1249_s20, %s1242_s12 }
  0x70   : > { %p1246_p8 = pneg %p1245_p6  ;;  %p1252_p3 = por %p1251_p13, %p1250_p11 }
  0x72   : > { %p1253_p5 = pnand %p1252_p3, %p1246_p8 }
  0x74   : > { %1256 = shalt.err (!%p1253_p5)
}
  0x75   : > { %1099 = dma.hbm_to_vmem [thread:$0]  (!%p1662_p0), %s1671_s21, 128, %s1674_s14, %s1678_s17  }
  0x76   : > { %s1464_s4 = smov [#allocation13]   ;;  %s1257_s19 = scalar_lea.hbm %s1924_s7, 512 }
  0x77   : > { %s291_s25 = sshll.u32 %s1464_s4, 4  ;;  %p1258_p4 = scmp.ne.s32.totalorder %s1924_s7, %s1257_s19  ;;  %s292_s25 = int_to_ptr.vmem [resolvable:$true] %s291_s25 }
  0x78   : > { %p1962_p8 = scmp.ne.s32.totalorder %s1953_s24, 0  ;;  %p1264_p7 = scmp.lt.u32.totalorder %s1257_s19, %s1924_s7 }
  0x7a   : > { %p1260_p11 = pnand %p1258_p4, %p1962_p8 }
  0x7c   : > { %p1261_p13 = pneg %p1260_p11 }
  0x7e   : > { %p1266_p10 = pnand %p1264_p7, %p1261_p13 }
  0x80   : > { %1269 = shalt.err (!%p1266_p10)
}
  0x81   : > { %s1270_s14 = scalar_lea.vmem %s292_s25, 512  ;;  %p1278_p6 = scmp.lt.s32.totalorder %s292_s25, %s292_s25 }
  0x82   : > { %p1271_p9 = scmp.ne.s32.totalorder %s292_s25, %s1270_s14  ;;  %p1279_p3 = scmp.lt.s32.totalorder %s1270_s14, %s1270_s14 }
  0x84   : > { %p1273_p12 = pnand %p1271_p9, %p1962_p8  ;;  %p1280_p5 = por %p1279_p3, %p1278_p6 }
  0x86   : > { %p1274_p1 = pneg %p1273_p12 }
  0x88   : > { %p1281_p0 = pnand %p1280_p5, %p1274_p1 }
  0x8a   : > { %1284 = shalt.err (!%p1281_p0)
}
  0x8b   : > { %p1963_p4 = scmp.ne.s32.totalorder %s1951_s16, 0  ;;  %s1964_s1 = smov 8  }
  0x8c   : > { %s1965_s27 = smov 128   ;;  %s1733_s19 = scalar_lea.hbm %s1917_s0, %s1660_s10 }
  0x8d   : > { %1092 = dma.hbm_to_vmem [thread:$0]  (!%p1963_p4), %s1924_s7, 512, %s292_s25, [#allocation12], %s1965_s27, %s1965_s27, %s1964_s1  }
  0x8e   : > { %s309_s16 = scalar_lea.vmem [#allocation2], %s1657_s18  ;;  %s1966_s12 = sand.u32 1, %s1453_s29  }
  0x8f   : > { %s316_s22 = sshll.u32 %s309_s16, 4  ;;  %s306_s20 = scalar_lea.sflag [#allocation3], %s1966_s12  ;;  %s317_s22 = int_to_ptr.vmem [resolvable:$true] %s316_s22 }
  0x90   : > { %s1285_s14 = scalar_lea.hbm %s1733_s19, 128  ;;  %s1290_s27 = scalar_lea.hbm %s1917_s0, 256 }
  0x91   : > { %p1286_p0 = scmp.ne.s32.totalorder %s1733_s19, %s1285_s14  ;;  %p1291_p13 = scmp.lt.u32.totalorder %s1733_s19, %s1917_s0 }
  0x92   : > { %p1292_p7 = scmp.lt.u32.totalorder %s1290_s27, %s1285_s14  ;;  %p1294_p9 = scmp.lt.u32.totalorder %s1285_s14, %s1733_s19 }
  0x93   : > { %p1288_p8 = pnand %p1286_p0, %p1684_p2 }
  0x94   : > { %p1293_p10 = por %p1292_p7, %p1291_p13 }
  0x95   : > { %p1289_p11 = pneg %p1288_p8 }
  0x96   : > { %p1295_p12 = por %p1294_p9, %p1293_p10 }
  0x98   : > { %p1296_p1 = pnand %p1295_p12, %p1289_p11 }
  0x9a   : > { %1299 = shalt.err (!%p1296_p1)
}
  0x9b   : > { %s1300_s24 = scalar_lea.vmem %s317_s22, 128  ;;  %s1465_s26 = smov [#allocation2]  }
  0x9c   : > { %p1301_p6 = scmp.ne.s32.totalorder %s317_s22, %s1300_s24  ;;  %s1305_s16 = sshll.u32 %s1465_s26, 4  ;;  %s1306_s16 = int_to_ptr.vmem [resolvable:$false] %s1305_s16 }
  0x9d   : > { %s1307_s12 = scalar_lea.vmem %s1306_s16, 256  ;;  %p1308_p4 = scmp.lt.s32.totalorder %s317_s22, %s1306_s16 }
  0x9e   : > { %p1303_p3 = pnand %p1301_p6, %p1684_p2  ;;  %p1309_p0 = scmp.lt.s32.totalorder %s1307_s12, %s1300_s24 }
  0xa0   : > { %p1304_p5 = pneg %p1303_p3  ;;  %p1310_p8 = por %p1309_p0, %p1308_p4 }
  0xa2   : > { %p1311_p7 = pnand %p1310_p8, %p1304_p5 }
  0xa4   : > { %1314 = shalt.err (!%p1311_p7)
}
  0xa5   : > { %p1967_p13 = scmp.ne.s32.totalorder %s1959_s15, 0  ;;  %s1759_s1 = scalar_lea.hbm %s1919_s2, %s1660_s10 }
  0xa6   : > { %s345_s27 = scalar_lea.vmem [#allocation7], %s1657_s18  ;;  %s1315_s4 = scalar_lea.hbm %s1759_s1, 128 }
  0xa7   : > { %1096 = dma.hbm_to_vmem [thread:$0]  (!%p1967_p13), %s1733_s19, 128, %s317_s22, %s306_s20  }
  0xa8   : > { %s352_s21 = sshll.u32 %s345_s27, 4  ;;  %p1316_p11 = scmp.ne.s32.totalorder %s1759_s1, %s1315_s4  ;;  %s353_s21 = int_to_ptr.vmem [resolvable:$true] %s352_s21 }
  0xa9   : > { %s1320_s19 = scalar_lea.hbm %s1919_s2, 256  ;;  %p1321_p12 = scmp.lt.u32.totalorder %s1759_s1, %s1919_s2 }
  0xaa   : > { %p1318_p10 = pnand %p1316_p11, %p1684_p2  ;;  %p1322_p1 = scmp.lt.u32.totalorder %s1320_s19, %s1315_s4 }
  0xab   : > { %p1324_p3 = scmp.lt.u32.totalorder %s1315_s4, %s1759_s1 }
  0xac   : > { %p1319_p9 = pneg %p1318_p10  ;;  %p1323_p6 = por %p1322_p1, %p1321_p12 }
  0xae   : > { %p1325_p5 = por %p1324_p3, %p1323_p6 }
  0xb0   : > { %p1326_p4 = pnand %p1325_p5, %p1319_p9 }
  0xb2   : > { %1329 = shalt.err (!%p1326_p4)
}
  0xb3   : > { %s1330_s16 = scalar_lea.vmem %s353_s21, 128  ;;  %s1466_s12 = smov [#allocation7]  }
  0xb4   : > { %p1331_p0 = scmp.ne.s32.totalorder %s353_s21, %s1330_s16  ;;  %s1335_s14 = sshll.u32 %s1466_s12, 4  ;;  %s1336_s14 = int_to_ptr.vmem [resolvable:$false] %s1335_s14 }
  0xb5   : > { %s1337_s25 = scalar_lea.vmem %s1336_s14, 256  ;;  %p1338_p11 = scmp.lt.s32.totalorder %s353_s21, %s1336_s14 }
  0xb6   : > { %p1333_p8 = pnand %p1331_p0, %p1684_p2  ;;  %p1339_p10 = scmp.lt.s32.totalorder %s1337_s25, %s1330_s16 }
  0xb8   : > { %p1334_p7 = pneg %p1333_p8  ;;  %p1340_p13 = por %p1339_p10, %p1338_p11 }
  0xba   : > { %p1341_p1 = pnand %p1340_p13, %p1334_p7 }
  0xbc   : > { %1344 = shalt.err (!%p1341_p1)
}
  0xbd   : > { %p1968_p12 = scmp.ne.s32.totalorder %s1959_s15, 0  ;;  %s1784_s24 = scalar_lea.hbm %s1920_s3, %s1660_s10 }
  0xbe   : > { %s363_s26 = scalar_lea.vmem [#allocation8], %s1657_s18  ;;  %s1969_s22 = sand.u32 1, %s1457_s30  }
  0xbf   : > { %1102 = dma.hbm_to_vmem [thread:$0]  (!%p1968_p12), %s1759_s1, 128, %s353_s21, %s1678_s17  }
  0xc0   : > { %s370_s19 = sshll.u32 %s363_s26, 4  ;;  %s360_s20 = scalar_lea.sflag [#allocation9], %s1969_s22  ;;  %s371_s19 = int_to_ptr.vmem [resolvable:$true] %s370_s19 }
  0xc1   : > { %s1345_s16 = scalar_lea.hbm %s1784_s24, 128  ;;  %s1350_s21 = scalar_lea.hbm %s1920_s3, 256 }
  0xc2   : > { %p1346_p13 = scmp.ne.s32.totalorder %s1784_s24, %s1345_s16  ;;  %p1351_p3 = scmp.lt.u32.totalorder %s1784_s24, %s1920_s3 }
  0xc3   : > { %p1352_p5 = scmp.lt.u32.totalorder %s1350_s21, %s1345_s16  ;;  %p1354_p0 = scmp.lt.u32.totalorder %s1345_s16, %s1784_s24 }
  0xc4   : > { %p1348_p9 = pnand %p1346_p13, %p1684_p2 }
  0xc5   : > { %p1353_p4 = por %p1352_p5, %p1351_p3 }
  0xc6   : > { %p1349_p6 = pneg %p1348_p9 }
  0xc7   : > { %p1355_p8 = por %p1354_p0, %p1353_p4 }
  0xc9   : > { %p1356_p7 = pnand %p1355_p8, %p1349_p6 }
  0xcb   : > { %1359 = shalt.err (!%p1356_p7)
}
  0xcc   : > { %s1360_s18 = scalar_lea.vmem %s371_s19, 128  ;;  %s1467_s14 = smov [#allocation8]  }
  0xcd   : > { %p1361_p11 = scmp.ne.s32.totalorder %s371_s19, %s1360_s18  ;;  %s1365_s25 = sshll.u32 %s1467_s14, 4  ;;  %s1366_s25 = int_to_ptr.vmem [resolvable:$false] %s1365_s25 }
  0xce   : > { %s1367_s27 = scalar_lea.vmem %s1366_s25, 256  ;;  %p1368_p13 = scmp.lt.s32.totalorder %s371_s19, %s1366_s25 }
  0xcf   : > { %p1363_p10 = pnand %p1361_p11, %p1684_p2  ;;  %p1369_p9 = scmp.lt.s32.totalorder %s1367_s27, %s1360_s18 }
  0xd1   : > { %p1364_p1 = pneg %p1363_p10  ;;  %p1370_p12 = por %p1369_p9, %p1368_p13 }
  0xd3   : > { %p1371_p3 = pnand %p1370_p12, %p1364_p1 }
  0xd5   : > { %1374 = shalt.err (!%p1371_p3)
}
  0xd6   : > { %p1970_p5 = scmp.ne.s32.totalorder %s1959_s15, 0  ;;  %p1971_p6 = scmp.ne.s32.totalorder %s1950_s13, 0 }
  0xd7   : > { %s1809_s6 = sand.u32 (!%p1971_p6), 1, %s1449_s28   ;;  %p1972_p2 = scmp.ne.s32.totalorder (!%p1971_p6), %s1947_s11, 0 }
  0xd8   : > { %1105 = dma.hbm_to_vmem [thread:$0]  (!%p1970_p5), %s1784_s24, 128, %s371_s19, %s360_s20  }
  0xd9   : > { %379 = sbr.rel (%p1971_p6) target bundleno = 1213 (0x4bd), region = 52  ;;  %s1812_s4 = sshll.u32 (!%p1971_p6), %s1809_s6, 3 }
  0xda   : > { %s382_s26 = scalar_lea.sflag (!%p1971_p6), [#allocation3], %s1809_s6  ;;  %s385_s22 = scalar_lea.vmem (!%p1971_p6), [#allocation2], %s1812_s4 }
  0xe0   : > { %1420 = dma.done.wait (%p1972_p2), %s382_s26, 128  }
  0xe1   : > { %1422 = vsyncadd (%p1972_p2), %s382_s26, 4294967168  ;;  %s390_s13 = sand.u32 1, %s1541_s9   ;;  %s394_s24 = scalar_lea.vmem [#allocation5], %s1812_s4 }
  0xe2   : > { %s391_s15 = scalar_lea.sflag [#allocation6], %s390_s13 }
  0xe3   : > { %1424 = dma.done.wait (%p1972_p2), %s391_s15, 256  }
  0xe4   : > { %1426 = vsyncadd (%p1972_p2), %s391_s15, 4294967040  ;;  %s403_s19 = scalar_lea.vmem [#allocation7], %s1812_s4  ;;  %s409_s20 = scalar_lea.sflag [#allocation9], %s390_s13 }
  0xe5   : > { %s412_s16 = scalar_lea.vmem [#allocation8], %s1812_s4 }
  0xe6   : > { %1428 = dma.done.wait (%p1972_p2), %s409_s20, 128  }
  0xe7   : > { %1430 = vsyncadd (%p1972_p2), %s409_s20, 4294967168  ;;  %p1973_p12 = scmp.eq.s32.totalorder %s1541_s9, 0 }
  0xe9   : > { %1432 = dma.done.wait (%p1973_p12), [#allocation9], 512   ;;  %p1974_p4 = pmov %p1973_p12 }
  0xeb   : > { %1434 = vsyncadd (%p1974_p4), [#allocation9], 4294966784  ;;  %p1975_p0 = pmov %p1974_p4 }
  0xed   : > { %1436 = dma.done.wait (%p1975_p0), [#allocation12], 1024   ;;  %p1976_p8 = pmov %p1975_p0 }
  0xee   : > { %v1468_v0 = vmov 0.0|0.0   ;;  %vm1469_vm0 = vmmov 0   ;;  %v1470_v1 = vmov 0.0   ;;  %v473_v2 = vld [vmem:[#allocation10] sm:$0xff]  ;;  %v474_v3 = vld [vmem:[#allocation10 + $0x8] sm:$0xff]  ;;  %v475_v4 = vld [vmem:[#allocation10 + $0x10] sm:$0xff] }
  0xef   : > { %1438 = vsyncadd (%p1976_p8), [#allocation12], 4294966272  ;;  %1043 = vmatprep.subr.bf16.mxu0 %v1468_v0  ;;  %1018 = vmatprep.mubr.msk.f32.mxu0 %vm1469_vm0, %v1470_v1  ;;  %v1044_v5 = vpack.c.bf16 %v474_v3, %v473_v2  ;;  %v476_v6 = vld [vmem:[#allocation10 + $0x18] sm:$0xff]  ;;  %v558_v7 = vld [vmem:[#allocation11] sm:$0xff]  ;;  %vm484_vm1 = vcmask 261120   ;;  %s1471_s11 = smov 96  }
  0xf0   : > { %1049 = vmatprep.subr.bf16.mxu1 %v1468_v0  ;;  %1029 = vmatprep.mubr.msk.f32.mxu1 %vm1469_vm0, %v1470_v1  ;;  %v559_v8 = vld [vmem:[#allocation11 + $0x8] sm:$0xff]  ;;  %v1047_v9 = vpack.c.bf16 %v476_v6, %v475_v4  ;;  %v560_v12 = vld [vmem:[#allocation11 + $0x10] sm:$0xff]  ;;  %v561_v13 = vld [vmem:[#allocation11 + $0x18] sm:$0xff]  ;;  %s1472_s17 = smov 32   ;;  %s1473_s1 = smov 64  }
  0xf1   : > { %1045 = vmatpush3.bf16.msra.mxu0 %v1044_v5  ;;  %v1050_v10 = vpack.c.bf16 %v559_v8, %v558_v7  ;;  %v472_v11 = vld [vmem:[%s385_s22] sm:$0xff]  ;;  %v1053_v14 = vpack.c.bf16 %v561_v13, %v560_v12  ;;  %v635_v15 = vld [vmem:[%s394_s24] sm:$0xff]  ;;  %s992_s12 = sshll.u32 %s1541_s9, 7  ;;  %s471_s18 = scalar_lea.vmem [#allocation14], %s1812_s4 }
  0xf2   : > { %1046 = vmatprep.subr.bf16.mxu0 %v1468_v0  ;;  %641 = vrot.lane.b32.xlu0 %v635_v15, %s1471_s11  ;;  %v987_v16 = vld [vmem:[%s1922_s5] ss:$0 sm:$0xff]  ;;  %v708_v34 = vld [vmem:[#allocation13 + $0x8] sm:$0xff]  ;;  %v709_v58 = vld [vmem:[#allocation13 + $0x10] sm:$0xff]  ;;  %s800_s14 = sshll.u32 %s471_s18, 4  ;;  %s1872_s26 = scalar_lea.hbm %s1925_s8, %s992_s12  ;;  %s1874_s14 = int_to_ptr.vmem [resolvable:$true] %s800_s14 }
  0xf3   : > { %1051 = vmatpush3.bf16.msra.mxu1 %v1050_v10  ;;  %655 = vrot.lane.b32.xlu1 %v635_v15, %s1472_s17  ;;  %v707_v33 = vld [vmem:[#allocation13] sm:$0xff]  ;;  %v710_v59 = vld [vmem:[#allocation13 + $0x18] sm:$0xff]  ;;  %s787_s22 = scalar_lea.sflag [#allocation4], %s1809_s6  ;;  %s1375_s13 = scalar_lea.vmem %s1874_s14, 128 }
  0xf4   : > { %1052 = vmatprep.subr.bf16.mxu1 %v1468_v0  ;;  %v1056_v35 = vpack.c.bf16 %v708_v34, %v707_v33  ;;  %v1059_v60 = vpack.c.bf16 %v710_v59, %v709_v58  ;;  %v683_v62 = vld [vmem:[%s403_s19] sm:$0xff]  ;;  %v711_v13 = vld [vmem:[%s412_s16] sm:$0xff]  ;;  %p1376_p7 = scmp.ne.s32.totalorder %s1874_s14, %s1375_s13  ;;  %p1977_p11 = scmp.ne.s32.totalorder %s1957_s23, 0 }
  0xf5   : > { %1048 = vmatpush3.bf16.msra.mxu0 %v1047_v9  ;;  %s1474_s9 = smov [#allocation14]  }
  0xf6   : > { %1055 = vmatprep.subr.bf16.mxu0 %v1468_v0  ;;  %648 = vrot.lane.b32.xlu0 %v635_v15, %s1473_s1  ;;  %p1377_p10 = pnand %p1376_p7, %p1977_p11  ;;  %s1379_s4 = sshll.u32 %s1474_s9, 4  ;;  %s1380_s4 = int_to_ptr.vmem [resolvable:$false] %s1379_s4 }
  0xf7   : > { %1054 = vmatpush3.bf16.msra.mxu1 %v1053_v14  ;;  %s1381_s15 = scalar_lea.vmem %s1380_s4, 256  ;;  %p1382_p13 = scmp.lt.s32.totalorder %s1874_s14, %s1380_s4 }
  0xf8   : > { %1019 = vmatmul.mubr.msk.f32.vlgmr.msra.gmra.mrb[0].mxu0 %vm484_vm1, %v472_v11  ;;  %p1378_p1 = pneg %p1377_p10  ;;  %p1383_p9 = scmp.lt.s32.totalorder %s1381_s15, %s1375_s13 }
  0xf9   : > { %1040 = vmatprep.mubr.msk.f32.mxu0 %vm1469_vm0, %v1470_v1  ;;  %1057 = vmatpush3.bf16.msra.mxu0 %v1056_v35 }
  0xfa   : > { %1058 = vmatprep.subr.bf16.mxu0 %v1468_v0  ;;  %p1384_p3 = por %p1383_p9, %p1382_p13 }
  0xfc   : > { %p1385_p5 = pnand %p1384_p3, %p1378_p1 }
  0xfd   : > { %1060 = vmatpush3.bf16.msra.mxu0 %v1059_v60 }
 0x164   : > { %v642_v20 = vpop.permute.xlu0 %641 }
 0x165   : > { %v656_v21 = vpop.permute.xlu1 %655 }
 0x168   : > { %v649_v22 = vpop.permute.xlu0 %648 }
 0x1cb   : > { %v554_v17 = vpop.f32.mrb[0].mxu0 }
 0x1cc   : > { %v555_v18 = vadd.f32 %v987_v16, %v554_v17  ;;  %v1020_v19 = vpop.f32.mrb[1].mxu0 }
 0x1ce   : > { %1030 = vmatmul.mubr.msk.f32.vlgmr.msra.gmra.mrb[0].mxu1 %vm484_vm1, %v555_v18 }
 0x2a1   : > { %v631_v23 = vpop.f32.mrb[0].mxu1 }
 0x2a2   : > { %v1031_v24 = vpop.f32.mrb[1].mxu1  ;;  %v644_v25 = vmul.f32 %v642_v20, %v631_v23  ;;  %v636_v26 = vmul.f32 %v635_v15, %v631_v23  ;;  %v651_v29 = vmul.f32 %v649_v22, %v631_v23  ;;  %v658_v30 = vmul.f32 %v656_v21, %v631_v23 }
 0x2a4   : > { %v645_v27 = vsel %vm484_vm1, %v644_v25, 0.0  ;;  %v637_v28 = vsel %vm484_vm1, %v636_v26, 0.0  ;;  %v652_v31 = vsel %vm484_vm1, %v651_v29, 0.0  ;;  %v659_v32 = vsel %vm484_vm1, %v658_v30, 0.0 }
 0x2a5   : > { %646 = vadd.xlane.f32.xlu0 %v645_v27  ;;  %638 = vadd.xlane.f32.xlu1 %v637_v28 }
 0x2a9   : > { %653 = vadd.xlane.f32.xlu0 %v652_v31  ;;  %660 = vadd.xlane.f32.xlu1 %v659_v32 }
 0x332   : > { %v647_v36 = vpop.xlane.xlu0 %646  ;;  %v639_v37 = vpop.xlane.xlu1 %638 }
 0x333   : > { %v662_v38 = vmax.f32 %v639_v37, %v647_v36 }
 0x336   : > { %v654_v39 = vpop.xlane.xlu0 %653  ;;  %v661_v41 = vpop.xlane.xlu1 %660 }
 0x337   : > { %v663_v40 = vmax.f32 %v662_v38, %v654_v39 }
 0x339   : > { %v664_v42 = vmax.f32 %v663_v40, %v661_v41 }
 0x33b   : > { %v665_v43 = vsub.f32 %v639_v37, %v664_v42  ;;  %v668_v44 = vsub.f32 %v647_v36, %v664_v42  ;;  %v671_v45 = vsub.f32 %v654_v39, %v664_v42  ;;  %v674_v46 = vsub.f32 %v661_v41, %v664_v42 }
 0x33d   : > { %v666_v47 = vmul.f32 1.442695, %v665_v43  ;;  %v669_v48 = vmul.f32 1.442695, %v668_v44  ;;  %v672_v49 = vmul.f32 1.442695, %v671_v45 }
 0x33e   : > { %v675_v50 = vmul.f32 1.442695, %v674_v46 }
 0x33f   : > { %1161 = vpow2.f32 %v666_v47 }
 0x340   : > { %1163 = vpow2.f32 %v669_v48 }
 0x341   : > { %1165 = vpow2.f32 %v672_v49 }
 0x342   : > { %1167 = vpow2.f32 %v675_v50 }
 0x349   : > { %v1162_v51 = vpop.eup %1161 }
 0x34a   : > { %v1164_v52 = vpop.eup %1163 }
 0x34b   : > { %v677_v53 = vadd.f32 %v1164_v52, %v1162_v51  ;;  %v1166_v54 = vpop.eup %1165 }
 0x34c   : > { %v1168_v56 = vpop.eup %1167 }
 0x34d   : > { %v678_v55 = vadd.f32 %v1166_v54, %v677_v53 }
 0x34f   : > { %v679_v57 = vadd.f32 %v1168_v56, %v678_v55 }
 0x351   : > { %1169 = vrcp.f32 %v679_v57 }
 0x35b   : > { %v1170_v61 = vpop.eup %1169 }
 0x35c   : > { %v693_v63 = vmul.f32 %v1170_v61, %v1166_v54  ;;  %v686_v0 = vmul.f32 %v1170_v61, %v1164_v52  ;;  %v682_v1 = vmul.f32 %v1170_v61, %v1162_v51  ;;  %v700_v4 = vmul.f32 %v1170_v61, %v1168_v56 }
 0x35e   : > { %v694_v2 = vmul.f32 %v693_v63, %v683_v62  ;;  %v687_v3 = vmul.f32 %v686_v0, %v683_v62  ;;  %v684_v5 = vmul.f32 %v683_v62, %v682_v1  ;;  %v701_v6 = vmul.f32 %v700_v4, %v683_v62 }
 0x360   : > { %696 = vrot.lane.b32.xlu1 %v694_v2, %s1473_s1  ;;  %689 = vrot.lane.b32.xlu0 %v687_v3, %s1471_s11 }
 0x364   : > { %703 = vrot.lane.b32.xlu1 %v701_v6, %s1472_s17 }
 0x3d2   : > { %v697_v7 = vpop.permute.xlu1 %696  ;;  %v690_v8 = vpop.permute.xlu0 %689 }
 0x3d3   : > { %v692_v9 = vadd.f32 %v690_v8, %v684_v5 }
 0x3d5   : > { %v699_v10 = vadd.f32 %v697_v7, %v692_v9 }
 0x3d6   : > { %v704_v11 = vpop.permute.xlu1 %703 }
 0x3d7   : > { %v706_v12 = vadd.f32 %v704_v11, %v699_v10 }
 0x3d9   : > { %1041 = vmatmul.mubr.msk.f32.vlgmr.msra.gmra.mrb[2].mxu0 %vm484_vm1, %v706_v12 }
 0x4ac   : > { %v781_v14 = vpop.f32.mrb[2].mxu0 }
 0x4ad   : > { %v782_v15 = vadd.f32 %v781_v14, %v711_v13  ;;  %v1042_v16 = vpop.f32.mrb[3].mxu0 }
 0x4af   : > { %785 = vst.msk [vmem:[%s471_s18] sm:$0xff] %vm484_vm1, %v782_v15 }
 0x4b0   : > { %1388 = shalt.err (!%p1385_p5)
}
 0x4b1   : > { %s1389_s6 = scalar_lea.hbm %s1872_s26, 128  ;;  %s1393_s20 = scalar_lea.hbm %s1925_s8, 256 }
 0x4b2   : > { %p1390_p6 = scmp.ne.s32.totalorder %s1872_s26, %s1389_s6  ;;  %p1394_p4 = scmp.lt.u32.totalorder %s1872_s26, %s1925_s8 }
 0x4b3   : > { %p1395_p0 = scmp.lt.u32.totalorder %s1393_s20, %s1389_s6  ;;  %p1397_p7 = scmp.lt.u32.totalorder %s1389_s6, %s1872_s26 }
 0x4b4   : > { %p1391_p2 = pnand %p1390_p6, %p1977_p11 }
 0x4b5   : > { %p1396_p8 = por %p1395_p0, %p1394_p4 }
 0x4b6   : > { %p1392_p12 = pneg %p1391_p2 }
 0x4b7   : > { %p1398_p10 = por %p1397_p7, %p1396_p8 }
 0x4b9   : > { %p1399_p1 = pnand %p1398_p10, %p1392_p12 }
 0x4bb   : > { %1402 = shalt.err (!%p1399_p1)
}
 0x4bc   : > { %1081 = dma.vmem_to_hbm [thread:$0]  (%p1977_p11), %s1874_s14, 128, %s1872_s26, %s787_s22  }
 0x4bd PF: > { %s1978_s17 = sld [smem:[#allocation21_spill]]  ;;  %s1979_s1 = sld [smem:[#allocation22_spill]] }
 0x4be   : > { %p1981_p9 = scmp.ge.s32.totalorder %s1457_s30, 2 }
 0x4c3   : > { %s812_s21 = sand.u32 1, %s1978_s17   ;;  %p1980_p13 = scmp.ne.s32.totalorder %s1979_s1, 0 }
 0x4c4   : > { %s813_s10 = scalar_lea.sflag [#allocation4], %s812_s21 }
 0x4c5   : > { %p1107_p3 = pnand %p1981_p9, %p1980_p13 }
 0x4c7   : > { %1440 = dma.done.wait (!%p1107_p3), %s813_s10, 128  }
 0x4c8   : > { %1442 = vsyncadd (!%p1107_p3), %s813_s10, 4294967168  ;;  %s1982_s30 = sld [smem:[#allocation23_spill]]  ;;  %s1983_s12 = sld [smem:[#allocation24_spill]] }
 0x4c9   : > { %s1984_s27 = smov %s1449_s28  ;;  %s1985_s28 = smov %s1453_s29 }
 0x4ce   : > { %p28_p5 = scmp.ge.s32.totalorder %s1982_s30, 4   ;;  %s1986_s29 = smov %s1983_s12 }
 0x4d0   :  { %30 = sbr.rel (!%p28_p5) target bundleno = 14 (0xe), region = 146 }
 0x4d7   :  { %818 = vsyncpa [#allocation3], 1 }
 0x4d8   :  { %820 = vsyncpa [#allocation3 + $0x1], 1 }
 0x4d9   :  { %821 = vsyncpa [#allocation6], 1 }
 0x4da   :  { %823 = vsyncpa [#allocation6 + $0x1], 1 }
 0x4db   :  { %824 = vsyncpa [#allocation9], 1 }
 0x4dc   :  { %826 = vsyncpa [#allocation9 + $0x1], 1 }
 0x4dd   :  { %827 = vsyncpa [#allocation12], 1 }
 0x4de   :  { %828 = vsyncpa [#allocation4], 1 }
 0x4df   :  { %830 = vsyncpa [#allocation4 + $0x1], 1 }

</bundles_post_ra>
